<compile_context>
chip_gen: v7x
topology: tpu7x:2x2x1
jax: 0.10.0
libtpu: 0.0.40
codegen_flags: <defaults>
</compile_context>

<pallas_src>
import functools

import jax
import jax.numpy as jnp
from jax.experimental import pallas as pl
from jax.experimental.pallas import tpu as pltpu

EPS = 1e-5  # torch.nn.LayerNorm default


# ---------------------------------------------------------------------------
# Helpers
# ---------------------------------------------------------------------------
def _nbytes(shape, dtype):
    n = 1
    for s in shape:
        n *= int(s)
    return n * jnp.dtype(dtype).itemsize


def _compiler_params(blocks, n_grid_axes=1):
    """dimension_semantics + explicit scoped-VMEM budget: 2x (double-buffered)
    every in/out block + 2 MiB headroom, clamped to [8 MiB, 64 MiB] (v7x physical)."""
    est = 2 * sum(_nbytes(s, d) for s, d in blocks) + (2 << 20)
    vmem = int(min(max(est, 8 << 20), 64 << 20))
    return pltpu.CompilerParams(
        dimension_semantics=("parallel",) * n_grid_axes,
        vmem_limit_bytes=vmem,
    )


def _pick_tile(rows, want, multiple=8):
    """Largest row tile <= `want` that divides `rows` and is a multiple of
    `multiple` (16 for bf16 outputs -> unmasked packed stores, 8 for f32)."""
    want = max(multiple, (want // multiple) * multiple)
    if rows <= want:
        return rows
    t = want
    while t >= multiple:
        if rows % t == 0:
            return t
        t -= multiple
    return rows


def _ln_stats(x):
    """One-pass LayerNorm stats: two independent XLU reductions + scalar math.
    Variance is clamped to >= 0 (cancellation guard)."""
    d = x.shape[-1]
    s = jnp.sum(x, axis=-1, keepdims=True)
    sq = jnp.sum(x * x, axis=-1, keepdims=True)
    mean = s * (1.0 / d)
    var = jnp.maximum(sq * (1.0 / d) - mean * mean, 0.0)
    return mean, jax.lax.rsqrt(var + EPS)


# ---------------------------------------------------------------------------
# Kernels
# ---------------------------------------------------------------------------
def ln_qkv_kernel(x_ref, w_ref, b_ref, o_ref):
    """o = normalize(x) @ W' + b'  (LN gamma/beta and attention scale folded into W', b')."""
    x = x_ref[...].astype(jnp.float32)
    mean, inv = _ln_stats(x)
    xn = ((x - mean) * inv).astype(jnp.bfloat16)
    y = jnp.dot(xn, w_ref[...], preferred_element_type=jnp.float32) + b_ref[...]
    o_ref[...] = y.astype(o_ref.dtype)


def attn_proj_res_kernel(qkv_ref, x_ref, wo_ref, bo_ref, o_ref, *, heads, dim_head, inner):
    """Fused per-batch attention + output projection + residual:
         o[b] = sum_h softmax(q_h k_h^T) v_h @ Wo[h*Dh:(h+1)*Dh, :] + bo + x[b]
    (the 1/sqrt(Dh) scale is already folded into the Q columns of Wqkv)."""
    qkv = qkv_ref[0]                 # (S, 3*inner) bf16, lane-dense
    wo = wo_ref[...]                 # (inner, D)   bf16, resident
    acc = x_ref[0].astype(jnp.float32) + bo_ref[...]    # (S, D) f32: residual + bias
    for h in range(heads):           # statically unrolled; heads is small
        off = h * dim_head
        q = qkv[:, off:off + dim_head]
        k = qkv[:, inner + off:inner + off + dim_head]
        v = qkv[:, 2 * inner + off:2 * inner + off + dim_head]
        s = jax.lax.dot_general(q, k, (((1,), (1,)), ((), ())),
                                preferred_element_type=jnp.float32)      # (S, S)
        m = jnp.max(s, axis=-1, keepdims=True)
        p = jnp.exp(s - m)
        l = jnp.sum(p, axis=-1, keepdims=True)
        a = (p * pl.reciprocal(l, approx=True)).astype(jnp.bfloat16)     # EUP rcp, VALU freed
        oh = jnp.dot(a, v, preferred_element_type=jnp.float32).astype(jnp.bfloat16)
        acc = acc + jnp.dot(oh, wo[off:off + dim_head, :],
                            preferred_element_type=jnp.float32)
    o_ref[0] = acc.astype(o_ref.dtype)
    # TODO(synk): for long sequences (S >~ 512) switch to a KV-tiled online-softmax
    # inner loop so the SxS f32 scores never materialize (v7x 64 MiB VMEM budget).


def ln_ff_residual_kernel(x_ref, w1_ref, b1_ref, w2_ref, b2_ref, o_ref):
    """o = GELU(normalize(x) @ W1' + b1') @ W2 + b2 + x  (gamma/beta folded into W1', b1')."""
    x = x_ref[...].astype(jnp.float32)
    mean, inv = _ln_stats(x)
    xn = ((x - mean) * inv).astype(jnp.bfloat16)
    h = jnp.dot(xn, w1_ref[...], preferred_element_type=jnp.float32) + b1_ref[...]
    # TODO(synk): torch.nn.GELU() default is exact erf-GELU; tanh approximation used here.
    h = jax.nn.gelu(h, approximate=True).astype(jnp.bfloat16)
    y = jnp.dot(h, w2_ref[...], preferred_element_type=jnp.float32) + b2_ref[...]
    o_ref[...] = (y + x).astype(o_ref.dtype)


# ---------------------------------------------------------------------------
# pallas_call wrappers
# ---------------------------------------------------------------------------
def ln_qkv(x2, w, b, tile_r):
    rows, d = x2.shape
    n = w.shape[1]
    tr = _pick_tile(rows, tile_r, multiple=16)   # bf16 output -> 16-row packing
    blocks = [((tr, d), x2.dtype), ((d, n), w.dtype), ((1, n), b.dtype),
              ((tr, n), jnp.bfloat16)]
    return pl.pallas_call(
        ln_qkv_kernel,
        out_shape=jax.ShapeDtypeStruct((rows, n), jnp.bfloat16),
        grid=(rows // tr,),
        in_specs=[
            pl.BlockSpec((tr, d), lambda i: (i, 0)),   # x tile (pipelined)
            pl.BlockSpec((d, n), lambda i: (0, 0)),    # W' resident
            pl.BlockSpec((1, n), lambda i: (0, 0)),    # b' resident
        ],
        out_specs=pl.BlockSpec((tr, n), lambda i: (i, 0)),
        compiler_params=_compiler_params(blocks),
    )(x2, w, b)


def attn_proj_residual(qkv_b, x_b, wo, bo, heads, dim_head):
    B, S, D = x_b.shape
    inner = heads * dim_head
    kern = functools.partial(attn_proj_res_kernel,
                             heads=heads, dim_head=dim_head, inner=inner)
    blocks = [((1, S, 3 * inner), qkv_b.dtype), ((1, S, D), x_b.dtype),
              ((inner, D), wo.dtype), ((1, D), bo.dtype), ((1, S, D), jnp.float32)]
    return pl.pallas_call(
        kern,
        out_shape=jax.ShapeDtypeStruct((B, S, D), jnp.float32),
        grid=(B,),
        in_specs=[
            pl.BlockSpec((1, S, 3 * inner), lambda b: (b, 0, 0)),  # qkv, lane-dense, no transpose
            pl.BlockSpec((1, S, D), lambda b: (b, 0, 0)),          # residual x
            pl.BlockSpec((inner, D), lambda b: (0, 0)),            # Wo resident
            pl.BlockSpec((1, D), lambda b: (0, 0)),                # bo resident
        ],
        out_specs=pl.BlockSpec((1, S, D), lambda b: (b, 0, 0)),
        compiler_params=_compiler_params(blocks),
    )(qkv_b, x_b, wo, bo)


def ln_ff_residual(x2, w1, b1, w2, b2, tile_r):
    rows, d = x2.shape
    m = w1.shape[1]
    tr = _pick_tile(rows, tile_r, multiple=8)
    blocks = [((tr, d), x2.dtype), ((d, m), w1.dtype), ((1, m), b1.dtype),
              ((m, d), w2.dtype), ((1, d), b2.dtype), ((tr, d), jnp.float32)]
    return pl.pallas_call(
        ln_ff_residual_kernel,
        out_shape=jax.ShapeDtypeStruct((rows, d), jnp.float32),
        grid=(rows // tr,),
        in_specs=[
            pl.BlockSpec((tr, d), lambda i: (i, 0)),   # x tile (pipelined)
            pl.BlockSpec((d, m), lambda i: (0, 0)),    # W1' resident
            pl.BlockSpec((1, m), lambda i: (0, 0)),    # b1' resident
            pl.BlockSpec((m, d), lambda i: (0, 0)),    # W2 resident
            pl.BlockSpec((1, d), lambda i: (0, 0)),    # b2 resident
        ],
        out_specs=pl.BlockSpec((tr, d), lambda i: (i, 0)),
        compiler_params=_compiler_params(blocks),
    )(x2, w1, b1, w2, b2)


def transformer_forward(x, layers, heads, dim_head, tile_r=256):
    """x: (B, S, D) f32.  layers: list of prepared (folded, bf16) parameter dicts."""
    B, S, D = x.shape
    rows = B * S
    inner = heads * dim_head
    x2 = x.reshape(rows, D).astype(jnp.float32)
    for lp in layers:
        # --- x = PreNorm(Attention)(x) + x -------------------------------------
        qkv = ln_qkv(x2, lp["wqkv_f"], lp["bqkv_f"], tile_r)        # (rows, 3*inner) bf16
        qkv_b = qkv.reshape(B, S, 3 * inner)                        # free view
        x_b = x2.reshape(B, S, D)                                   # free view
        x_b = attn_proj_residual(qkv_b, x_b, lp["wo"], lp["bo"], heads, dim_head)
        x2 = x_b.reshape(rows, D)                                   # (rows, D) f32
        # --- x = PreNorm(FeedForward)(x) + x -----------------------------------
        x2 = ln_ff_residual(x2, lp["w1_f"], lp["b1_f"], lp["w2"], lp["b2"], tile_r)
    return x2.reshape(B, S, D)


def prepare_layer(p, heads, dim_head):
    """Offline folds: attention scale into the Q columns of Wqkv, LayerNorm
    gamma/beta into the following Linear; weights cast to bf16."""
    inner = heads * dim_head
    scale = dim_head ** (-0.5)
    # fold 1/sqrt(Dh) into the Q columns (first `inner` columns of Wqkv)
    col_scale = jnp.concatenate([jnp.full((inner,), scale, jnp.float32),
                                 jnp.ones((2 * inner,), jnp.float32)])
    wqkv_s = p["wqkv"] * col_scale[None, :]
    # to_qkv is nn.Linear(..., bias=False) in the spec -> only the LN beta term folds in
    wqkv_f = (p["g1"][:, None] * wqkv_s).astype(jnp.bfloat16)
    bqkv_f = (p["be1"] @ wqkv_s).reshape(1, -1).astype(jnp.float32)
    w1_f = (p["g2"][:, None] * p["w1"]).astype(jnp.bfloat16)
    b1_f = (p["be2"] @ p["w1"] + p["b1"]).reshape(1, -1).astype(jnp.float32)
    return dict(
        wqkv_f=wqkv_f, bqkv_f=bqkv_f,
        wo=p["wo"].astype(jnp.bfloat16), bo=p["bo"].reshape(1, -1).astype(jnp.float32),
        w1_f=w1_f, b1_f=b1_f,
        w2=p["w2"].astype(jnp.bfloat16), b2=p["b2"].reshape(1, -1).astype(jnp.float32),
    )


# ---------------------------------------------------------------------------
# Pure-JAX reference (mirrors the bf16-matmul / f32-accumulate choices)
# ---------------------------------------------------------------------------
def _layernorm_ref(x, gamma, beta):
    mean = jnp.mean(x, axis=-1, keepdims=True)
    var = jnp.mean((x - mean) ** 2, axis=-1, keepdims=True)
    return (x - mean) * jax.lax.rsqrt(var + EPS) * gamma + beta


def transformer_ref(x, raw_layers, heads, dim_head):
    B, S, D = x.shape
    inner = heads * dim_head
    scale = dim_head ** (-0.5)
    bf = jnp.bfloat16
    for p in raw_layers:
        y = _layernorm_ref(x, p["g1"], p["be1"]).astype(bf)
        qkv = jnp.einsum("bsd,de->bse", y, p["wqkv"].astype(bf),
                         preferred_element_type=jnp.float32)
        q, k, v = jnp.split(qkv, 3, axis=-1)
        sh = lambda t: t.reshape(B, S, heads, dim_head).transpose(0, 2, 1, 3).astype(bf)
        q, k, v = sh(q), sh(k), sh(v)
        s = jnp.einsum("bhqd,bhkd->bhqk", q, k,
                       preferred_element_type=jnp.float32) * scale
        a = jax.nn.softmax(s, axis=-1).astype(bf)
        o = jnp.einsum("bhqk,bhkd->bhqd", a, v, preferred_element_type=jnp.float32)
        o = o.transpose(0, 2, 1, 3).reshape(B, S, inner).astype(bf)
        attn_out = jnp.einsum("bsi,id->bsd", o, p["wo"].astype(bf),
                              preferred_element_type=jnp.float32) + p["bo"]
        x = attn_out + x
        y = _layernorm_ref(x, p["g2"], p["be2"]).astype(bf)
        h = jnp.einsum("bsd,dm->bsm", y, p["w1"].astype(bf),
                       preferred_element_type=jnp.float32) + p["b1"]
        h = jax.nn.gelu(h, approximate=True).astype(bf)
        ff = jnp.einsum("bsm,md->bsd", h, p["w2"].astype(bf),
                        preferred_element_type=jnp.float32) + p["b2"]
        x = ff + x
    return x


# ---------------------------------------------------------------------------
if __name__ == "__main__":
    key = jax.random.PRNGKey(0)
    B, S = 2, 16
    dim, depth, heads, dim_head, mlp_dim = 128, 2, 2, 64, 256  # dim multiple of 128 (lane-dense)
    inner = heads * dim_head

    keys = jax.random.split(key, 1 + depth * 10)
    x = jax.random.normal(keys[0], (B, S, dim), dtype=jnp.float32)

    raw_layers = []
    ki = 1
    for _ in range(depth):
        g1 = 1.0 + 0.1 * jax.random.normal(keys[ki], (dim,), jnp.float32); ki += 1
        be1 = 0.1 * jax.random.normal(keys[ki], (dim,), jnp.float32); ki += 1
        wqkv = jax.random.normal(keys[ki], (dim, 3 * inner), jnp.float32) / jnp.sqrt(dim); ki += 1
        wo = jax.random.normal(keys[ki], (inner, dim), jnp.float32) / jnp.sqrt(inner); ki += 1
        bo = 0.1 * jax.random.normal(keys[ki], (dim,), jnp.float32); ki += 1
        g2 = 1.0 + 0.1 * jax.random.normal(keys[ki], (dim,), jnp.float32); ki += 1
        be2 = 0.1 * jax.random.normal(keys[ki], (dim,), jnp.float32); ki += 1
        w1 = jax.random.normal(keys[ki], (dim, mlp_dim), jnp.float32) / jnp.sqrt(dim); ki += 1
        b1 = 0.1 * jax.random.normal(keys[ki], (mlp_dim,), jnp.float32); ki += 1
        w2 = jax.random.normal(keys[ki], (mlp_dim, dim), jnp.float32) / jnp.sqrt(mlp_dim); ki += 1
        b2 = jnp.zeros((dim,), jnp.float32)
        raw_layers.append(dict(g1=g1, be1=be1, wqkv=wqkv, wo=wo, bo=bo,
                               g2=g2, be2=be2, w1=w1, b1=b1, w2=w2, b2=b2))

    kernel_layers = [prepare_layer(p, heads, dim_head) for p in raw_layers]

    # tile_r=16 at this toy size -> 2 row tiles per row-tiled kernel, exercising the pipeline.
    out = transformer_forward(x, kernel_layers, heads, dim_head, tile_r=16)
    out = jax.block_until_ready(out)

    ref = transformer_ref(x, raw_layers, heads, dim_head)
    assert out.shape == (B, S, dim)
    assert jnp.allclose(out, ref, atol=5e-2, rtol=5e-2), "mismatch vs reference"

    print("KERNEL_OK")
</pallas_src>

<mosaic_0001>
module attributes {stable_mosaic.version = 11 : i64} {
  func.func @ln_qkv_kernel(%arg0: i32, %arg1: memref<16x128xf32, #tpu.memory_space<vmem>>, %arg2: memref<128x384xbf16, #tpu.memory_space<vmem>>, %arg3: memref<1x384xf32, #tpu.memory_space<vmem>>, %arg4: memref<16x384xbf16, #tpu.memory_space<vmem>>) attributes {dimension_semantics = [#tpu.dimension_semantics<parallel>], iteration_bounds = array<i64: 2>, scalar_prefetch = 0 : i64, scratch_operands = 0 : i64, tpu.core_type = #tpu.core_type<tc>, window_params = [{transform_indices = @transform_0, window_bounds = array<i64: 16, 128>}, {pipeline_mode = #tpu.pipeline_mode<synchronous>, transform_indices = @transform_1, window_bounds = array<i64: 128, 384>}, {pipeline_mode = #tpu.pipeline_mode<synchronous>, transform_indices = @transform_2, window_bounds = array<i64: 1, 384>}, {transform_indices = @transform_3, window_bounds = array<i64: 16, 384>}]} {
    %c0 = arith.constant 0 : index
    %c0_0 = arith.constant 0 : index
    %0 = vector.load %arg1[%c0, %c0_0] : memref<16x128xf32, #tpu.memory_space<vmem>>, vector<16x128xf32>
    %cst = arith.constant dense<0.000000e+00> : vector<16xf32>
    %1 = vector.multi_reduction <add>, %0, %cst [1] : vector<16x128xf32> to vector<16xf32>
    %2 = vector.shape_cast %1 : vector<16xf32> to vector<16x1xf32>
    %3 = arith.mulf %0, %0 : vector<16x128xf32>
    %cst_1 = arith.constant dense<0.000000e+00> : vector<16xf32>
    %4 = vector.multi_reduction <add>, %3, %cst_1 [1] : vector<16x128xf32> to vector<16xf32>
    %5 = vector.shape_cast %4 : vector<16xf32> to vector<16x1xf32>
    %cst_2 = arith.constant 7.812500e-03 : f32
    %6 = vector.broadcast %cst_2 : f32 to vector<16x1xf32>
    %7 = arith.mulf %2, %6 : vector<16x1xf32>
    %cst_3 = arith.constant 7.812500e-03 : f32
    %8 = vector.broadcast %cst_3 : f32 to vector<16x1xf32>
    %9 = arith.mulf %5, %8 : vector<16x1xf32>
    %10 = arith.mulf %7, %7 : vector<16x1xf32>
    %11 = arith.subf %9, %10 : vector<16x1xf32>
    %cst_4 = arith.constant 0.000000e+00 : f32
    %12 = vector.broadcast %cst_4 : f32 to vector<16x1xf32>
    %13 = arith.maximumf %11, %12 : vector<16x1xf32>
    %cst_5 = arith.constant 9.99999974E-6 : f32
    %14 = vector.broadcast %cst_5 : f32 to vector<16x1xf32>
    %15 = arith.addf %13, %14 : vector<16x1xf32>
    %16 = math.rsqrt %15 : vector<16x1xf32>
    %17 = vector.broadcast %7 : vector<16x1xf32> to vector<16x128xf32>
    %18 = arith.subf %0, %17 : vector<16x128xf32>
    %19 = vector.broadcast %16 : vector<16x1xf32> to vector<16x128xf32>
    %20 = arith.mulf %18, %19 : vector<16x128xf32>
    %21 = arith.truncf %20 : vector<16x128xf32> to vector<16x128xbf16>
    %c0_6 = arith.constant 0 : index
    %c0_7 = arith.constant 0 : index
    %22 = vector.load %arg2[%c0_6, %c0_7] : memref<128x384xbf16, #tpu.memory_space<vmem>>, vector<128x384xbf16>
    %cst_8 = arith.constant dense<0.000000e+00> : vector<16x384xf32>
    %23 = tpu.matmul %21, %22, %cst_8 {dimension_numbers = #tpu.dot_dimension_numbers<[1], [0], [0], [1], [0, 0, 1, 1], [], []>} : vector<16x128xbf16>, vector<128x384xbf16>, vector<16x384xf32> -> vector<16x384xf32>
    %c0_9 = arith.constant 0 : index
    %c0_10 = arith.constant 0 : index
    %24 = vector.load %arg3[%c0_9, %c0_10] : memref<1x384xf32, #tpu.memory_space<vmem>>, vector<1x384xf32>
    %25 = vector.broadcast %24 : vector<1x384xf32> to vector<16x384xf32>
    %26 = arith.addf %23, %25 : vector<16x384xf32>
    %27 = arith.truncf %26 : vector<16x384xf32> to vector<16x384xbf16>
    %c0_11 = arith.constant 0 : index
    %c0_12 = arith.constant 0 : index
    %28 = vector.load %arg4[%c0_11, %c0_12] : memref<16x384xbf16, #tpu.memory_space<vmem>>, vector<16x384xbf16>
    tpu.vector_store %arg4[%c0_11, %c0_12], %27 {strides = array<i32>} : memref<16x384xbf16, #tpu.memory_space<vmem>>, vector<16x384xbf16>,
    return
  }
  func.func @transform_0(%arg0: i32) -> (i32, i32) {
    %c0_i32 = arith.constant 0 : i32
    %c0_i32_0 = arith.constant 0 : i32
    return %arg0, %c0_i32 : i32, i32
  }
  func.func @transform_1(%arg0: i32) -> (i32, i32) {
    %c0_i32 = arith.constant 0 : i32
    %c0_i32_0 = arith.constant 0 : i32
    %c0_i32_1 = arith.constant 0 : i32
    return %c0_i32, %c0_i32_0 : i32, i32
  }
  func.func @transform_2(%arg0: i32) -> (i32, i32) {
    %c0_i32 = arith.constant 0 : i32
    %c0_i32_0 = arith.constant 0 : i32
    %c0_i32_1 = arith.constant 0 : i32
    return %c0_i32, %c0_i32_0 : i32, i32
  }
  func.func @transform_3(%arg0: i32) -> (i32, i32) {
    %c0_i32 = arith.constant 0 : i32
    %c0_i32_0 = arith.constant 0 : i32
    return %arg0, %c0_i32 : i32, i32
  }
}

</mosaic_0001>

<bundles_post_ra>
// kernel: tpu_custom_call.1
= control target key start
LH: loop header
LB: loop body
LE: loop exit
PB: predicated region body
PF: predicated region fallthrough
CT: control target
= control target key end

     0   :  { %8 = vsyncpa [#allocation3], 0  ;;  %s1190_s0 = inlined_call_operand.hbm [shape: f32[32,128], index: 0, kind: input, shape index: {}]   ;;  %s1191_s1 = inlined_call_operand.hbm [shape: bf16[128,384], index: 1, kind: input, shape index: {}]   ;;  %s1192_s2 = inlined_call_operand.vmem [shape: f32[1,384], index: 2, kind: input, shape index: {}]   ;;  %s1193_s3 = inlined_call_operand.hbm [shape: bf16[32,384], index: 3, kind: output, shape index: {}]  }
   0x1   :  { %10 = vsyncpa [#allocation3 + $0x1], 0 }
   0x2   :  { %11 = vsyncpa [#allocation6], 0 }
   0x3   :  { %12 = vsyncpa [#allocation4], 0 }
   0x4   :  { %14 = vsyncpa [#allocation4 + $0x1], 0  ;;  %s964_s12 = smov 0   ;;  %s966_s13 = smov 0  }
   0x5   :  { %s968_s14 = smov 0   ;;  %s970_s15 = smov 0  }
   0x6 LB: > { %s985_s16 = sadd.s32 4294967295, %s930_s15   ;;  %s621_s17 = sadd.s32 4294967294, %s930_s15   ;;  %s930_s15 = sphi %s970_s15, %s1213_s15   ;;  %s926_s14 = sphi %s968_s14, %s1212_s14   ;;  %s922_s13 = sphi %s966_s13, %s1211_s13   ;;  %s918_s12 = sphi %s964_s12, %s1210_s12  }
   0x7   : > { %p40_p0 = scmp.ne.s32.totalorder %s922_s13, %s918_s12  ;;  %p1194_p1 = scmp.eq.s32.totalorder %s985_s16, 0 }
   0x8   : > { %p112_p3 = scmp.eq.s32.totalorder %s621_s17, 1  ;;  %p622_p5 = scmp.ge.s32.totalorder %s930_s15, 1 }
   0x9   : > { %p994_p4 = por %p1194_p1, %p40_p0  ;;  %p119_p7 = scmp.lt.s32.totalorder %s930_s15, 3 }
   0xa   : > { %p999_p6 = por %p112_p3, %p40_p0  ;;  %s932_s21 = smov [#allocation5]  }
   0xb   : > { %s1197_s18 = scalar_select %p994_p4, 1, 0 }
   0xc   : > { %s1198_s19 = scalar_select %p999_p6, 1, 0 }
   0xd   : > { %p1004_p8 = pnand %p622_p5, %p119_p7  ;;  %s131_s22 = sshll.u32 %s932_s21, 4  ;;  %s1008_s22 = int_to_ptr.vmem [resolvable:$true] %s131_s22 }
   0xe   : > { %s1020_s24 = sadd.s32 1, %s930_s15   ;;  %s27_s25 = sadd.s32 1, %s926_s14 }
   0xf   : > { %s1199_s20 = scalar_select %p1004_p8, 1, 0 }
  0x10   : > { %p708_p9 = pneg %p1004_p8  ;;  %s24_s26 = ssub.s32 %s930_s15, %s1020_s24 }
  0x11   : > { %s802_s29 = scalar_lea.hbm %s1191_s1, 3072 }
  0x12   : > { %p1015_p11 = pnand %p708_p9, %p1194_p1  ;;  %p803_p12 = scmp.ne.s32.totalorder %s1191_s1, %s802_s29 }
  0x13   : > { %p809_p5 = scmp.lt.u32.totalorder %s802_s29, %s1191_s1 }
  0x14   : > { %p804_p13 = pneg %p1015_p11 }
  0x16   : > { %p805_p0 = pnand %p804_p13, %p803_p12 }
  0x18   : > { %p806_p3 = pneg %p805_p0 }
  0x1a   : > { %p811_p7 = pnand %p809_p5, %p806_p3 }
  0x1c   : > { %814 = shalt.err (!%p811_p7)
}
  0x1d   : > { %s815_s7 = scalar_lea.vmem %s1008_s22, 3072  ;;  %p823_p2 = scmp.lt.s32.totalorder %s1008_s22, %s1008_s22 }
  0x1e   : > { %p816_p9 = scmp.ne.s32.totalorder %s1008_s22, %s815_s7  ;;  %p824_p6 = scmp.lt.s32.totalorder %s815_s7, %s815_s7 }
  0x20   : > { %p818_p10 = pnand %p816_p9, %p804_p13  ;;  %p825_p4 = por %p824_p6, %p823_p2 }
  0x22   : > { %p819_p1 = pneg %p818_p10 }
  0x24   : > { %p826_p8 = pnand %p825_p4, %p819_p1 }
  0x26   : > { %829 = shalt.err (!%p826_p8)
}
  0x27   : > { %s933_s8 = smov 192   ;;  %s934_s9 = smov 12  }
  0x28   : > { %711 = dma.hbm_to_vmem [thread:$0]  (!%p1015_p11), %s1191_s1, 3072, %s1008_s22, [#allocation6], %s933_s8, %s933_s8, %s934_s9  }
  0x29   : > { %p25_p2 = scmp.eq.s32.totalorder %s24_s26, 0  ;;  %p34_p1 = scmp.ne.s32.totalorder %s926_s14, %s922_s13 }
  0x2a   : > { %p35_p4 = scmp.eq.s32.totalorder %s930_s15, 0  ;;  %p721_p6 = scmp.lt.s32.totalorder %s930_s15, 2 }
  0x2b   : > { %s1051_s17 = scalar_select %p25_p2, %s926_s14, %s27_s25  }
  0x2c   : > { %p36_p8 = por %p35_p4, %p34_p1  ;;  %p1201_p10 = scmp.eq.s32.totalorder %s985_s16, 1 }
  0x2d   : > { %s148_s27 = sand.u32 1, %s926_s14   ;;  %s664_s28 = sshll.u32 %s930_s15, 8 }
  0x2e   : > { %p1055_p12 = por %p1201_p10, %p34_p1  ;;  %s625_s29 = sshll.u32 %s148_s27, 4 }
  0x2f   : > { %s1064_s4 = scalar_lea.hbm %s1190_s0, %s664_s28  ;;  %s152_s22 = scalar_lea.vmem [#allocation2], %s625_s29 }
  0x30   : > { %s159_s25 = sshll.u32 %s152_s22, 4  ;;  %p1066_p11 = pnand %p721_p6, %p36_p8  ;;  %s1070_s25 = int_to_ptr.vmem [resolvable:$true] %s159_s25 }
  0x31   : > { %s1072_s5 = scalar_lea.sflag [#allocation3], %s148_s27  ;;  %s830_s6 = scalar_lea.hbm %s1064_s4, 256 }
  0x32   : > { %p831_p13 = scmp.ne.s32.totalorder %s1064_s4, %s830_s6  ;;  %p832_p0 = pneg %p1066_p11 }
  0x33   : > { %s835_s9 = scalar_lea.hbm %s1190_s0, 512  ;;  %p836_p7 = scmp.lt.u32.totalorder %s1064_s4, %s1190_s0 }
  0x34   : > { %p833_p3 = pnand %p832_p0, %p831_p13  ;;  %p837_p9 = scmp.lt.u32.totalorder %s835_s9, %s830_s6 }
  0x35   : > { %p839_p1 = scmp.lt.u32.totalorder %s830_s6, %s1064_s4 }
  0x36   : > { %p834_p5 = pneg %p833_p3  ;;  %p838_p2 = por %p837_p9, %p836_p7 }
  0x38   : > { %p840_p4 = por %p839_p1, %p838_p2 }
  0x3a   : > { %p841_p6 = pnand %p840_p4, %p834_p5 }
  0x3c   : > { %844 = shalt.err (!%p841_p6)
}
  0x3d   : > { %s845_s27 = scalar_lea.vmem %s1070_s25, 256  ;;  %s935_s28 = smov [#allocation2]  }
  0x3e   : > { %p846_p8 = scmp.ne.s32.totalorder %s1070_s25, %s845_s27  ;;  %s850_s29 = sshll.u32 %s935_s28, 4  ;;  %s851_s29 = int_to_ptr.vmem [resolvable:$false] %s850_s29 }
  0x3f   : > { %s852_s23 = scalar_lea.vmem %s851_s29, 512  ;;  %p853_p3 = scmp.lt.s32.totalorder %s1070_s25, %s851_s29 }
  0x40   : > { %p848_p10 = pnand %p846_p8, %p832_p0  ;;  %p854_p7 = scmp.lt.s32.totalorder %s852_s23, %s845_s27 }
  0x42   : > { %p849_p13 = pneg %p848_p10  ;;  %p855_p9 = por %p854_p7, %p853_p3 }
  0x44   : > { %p856_p2 = pnand %p855_p9, %p849_p13 }
  0x46   : > { %859 = shalt.err (!%p856_p2)
}
  0x47   : > { %s936_s30 = smov 128   ;;  %s937_s22 = smov 8  }
  0x48   : > { %715 = dma.hbm_to_vmem [thread:$0]  (!%p1066_p11), %s1064_s4, 256, %s1070_s25, %s1072_s5, %s936_s30, %s936_s30, %s937_s22  }
  0x49   : > { %p1204_p0 = scmp.ne.s32.totalorder %s1199_s20, 0 }
  0x4a   : > { %s1103_s6 = sand.u32 (!%p1204_p0), 1, %s922_s13   ;;  %p1205_p5 = scmp.ne.s32.totalorder (!%p1204_p0), %s1197_s18, 0 }
  0x4b   : > { %171 = sbr.rel (%p1204_p0) target bundleno = 492 (0x1ec), region = 32  ;;  %s629_s7 = sshll.u32 (!%p1204_p0), %s1103_s6, 4 }
  0x4c   : > { %s174_s8 = scalar_lea.sflag (!%p1204_p0), [#allocation3], %s1103_s6  ;;  %s177_s9 = scalar_lea.vmem (!%p1204_p0), [#allocation2], %s629_s7 }
  0x52   : > { %905 = dma.done.wait (%p1205_p5), %s174_s8, 256  }
  0x53   : > { %907 = vsyncadd (%p1205_p5), %s174_s8, 4294967040  ;;  %p1206_p1 = scmp.eq.s32.totalorder %s985_s16, 0 }
  0x55   : > { %909 = dma.done.wait (%p1206_p1), [#allocation6], 3072   ;;  %p1207_p11 = pmov %p1206_p1 }
  0x56   : > { %v938_v0 = vmov 0.0   ;;  %v1116_v1 = vld [vmem:[%s177_s9] sm:$0xff]  ;;  %v1118_v2 = vld [vmem:[%s177_s9 + $0x8] sm:$0xff]  ;;  %v939_v27 = vmov 0   ;;  %vm940_vm0 = vmmov 0   ;;  %v272_v53 = vlaneseq  ;;  %s698_s4 = smul.u32 24, %s1103_s6 }
  0x57   : > { %911 = vsyncadd (%p1207_p11), [#allocation6], 4294964224  ;;  %678 = vmatprep.subr.bf16.mxu1 %v938_v0  ;;  %209 = vadd.xlane.f32.xlu0 %v1116_v1  ;;  %v213_v3 = vmul.f32 %v1116_v1, %v1116_v1  ;;  %v766_v4 = vld [vmem:[#allocation5 + $0x4] ss:$12 sps:$4 sm:$0xff]   ;;  %v768_v5 = vld [vmem:[#allocation5] ss:$12 sps:$4 sm:$0xff]   ;;  %v214_v7 = vmul.f32 %v1118_v2, %v1118_v2 }
  0x58   : > { %v769_v6 = vld [vmem:[#allocation5 + $0x8] ss:$12 sps:$4 sm:$0xff]   ;;  %415 = vmatprep.subr.bf16.mxu0 %v766_v4  ;;  %v772_v9 = vld [vmem:[#allocation5 + $0x18] ss:$12 sps:$4 sm:$0xff]   ;;  %v773_v10 = vld [vmem:[#allocation5 + $0x20] ss:$12 sps:$4 sm:$0xff]   ;;  %447 = vmatprep.mubr.bf16.mxu0 %v939_v27 }
  0x59   : > { %215 = vadd.xlane.f32.xlu1 %v213_v3  ;;  %416 = vmatpush1.bf16.msra.mxu0 %v768_v5  ;;  %v770_v8 = vld [vmem:[#allocation5 + $0x1c] ss:$12 sps:$4 sm:$0xff]   ;;  %v774_v11 = vld [vmem:[#allocation5 + $0x34] ss:$12 sps:$4 sm:$0xff]   ;;  %v777_v13 = vld [vmem:[#allocation5 + $0x38] ss:$12 sps:$4 sm:$0xff]  }
  0x5a   : > { %679 = vmatpush3.bf16.msra.mxu1 %v769_v6  ;;  %417 = vmatprep.subr.bf16.mxu0 %v770_v8  ;;  %v776_v12 = vld [vmem:[#allocation5 + $0x30] ss:$12 sps:$4 sm:$0xff]   ;;  %v778_v14 = vld [vmem:[#allocation5 + $0x4c] ss:$12 sps:$4 sm:$0xff]   ;;  %v780_v15 = vld [vmem:[#allocation5 + $0x48] ss:$12 sps:$4 sm:$0xff]  }
  0x5b   : > { %211 = vadd.xlane.f32.xlu0 %v1118_v2  ;;  %680 = vmatprep.subr.bf16.mxu1 %v938_v0  ;;  %v781_v16 = vld [vmem:[#allocation5 + $0x50] ss:$12 sps:$4 sm:$0xff]   ;;  %v784_v18 = vld [vmem:[#allocation5 + $0x60] ss:$12 sps:$4 sm:$0xff]   ;;  %v785_v19 = vld [vmem:[#allocation5 + $0x68] ss:$12 sps:$4 sm:$0xff]  }
  0x5c   : > { %v782_v17 = vld [vmem:[#allocation5 + $0x64] ss:$12 sps:$4 sm:$0xff]   ;;  %v786_v20 = vld [vmem:[#allocation5 + $0x7c] ss:$12 sps:$4 sm:$0xff]   ;;  %v789_v22 = vld [vmem:[#allocation5 + $0x80] ss:$12 sps:$4 sm:$0xff]   ;;  %694 = vmatprep.mubr.msk.bf16.mxu1 %vm940_vm0, %v938_v0 }
  0x5d   : > { %217 = vadd.xlane.f32.xlu1 %v214_v7  ;;  %418 = vmatpush1.bf16.msra.mxu0 %v772_v9  ;;  %v788_v21 = vld [vmem:[#allocation5 + $0x78] ss:$12 sps:$4 sm:$0xff]   ;;  %v790_v23 = vld [vmem:[#allocation5 + $0x94] ss:$12 sps:$4 sm:$0xff]   ;;  %v792_v24 = vld [vmem:[#allocation5 + $0x90] ss:$12 sps:$4 sm:$0xff]  }
  0x5e   : > { %681 = vmatpush3.bf16.msra.mxu1 %v773_v10  ;;  %419 = vmatprep.subr.bf16.mxu0 %v774_v11  ;;  %v793_v25 = vld [vmem:[#allocation5 + $0x98] ss:$12 sps:$4 sm:$0xff]   ;;  %v796_v28 = vld [vmem:[#allocation5 + $0xa8] ss:$12 sps:$4 sm:$0xff]   ;;  %v797_v29 = vld [vmem:[#allocation5 + $0xb0] ss:$12 sps:$4 sm:$0xff]  }
  0x5f   : > { %682 = vmatprep.subr.bf16.mxu1 %v938_v0  ;;  %v794_v26 = vld [vmem:[#allocation5 + $0xac] ss:$12 sps:$4 sm:$0xff]   ;;  %v273_v54 = vshrl.u32 %v272_v53, 7  ;;  %v270_v57 = vld [vmem:[%s1192_s2] sm:$0x7]  ;;  %s203_s25 = scalar_lea.vmem [#allocation7], %s698_s4 }
  0x60   : > { %s538_s26 = sshll.u32 %s203_s25, 4  ;;  %s699_s5 = smul.u32 384, %s985_s16  ;;  %s1141_s26 = int_to_ptr.vmem [resolvable:$true] %s538_s26 }
  0x61   : > { %420 = vmatpush1.bf16.msra.mxu0 %v776_v12  ;;  %v274_v55 = vsub.s32 0, %v273_v54  ;;  %v282_v56 = vsub.s32 2, %v273_v54  ;;  %v278_v58 = vsub.s32 1, %v273_v54  ;;  %s524_s27 = scalar_lea.sflag [#allocation4], %s1103_s6  ;;  %s860_s28 = scalar_lea.vmem %s1141_s26, 384 }
  0x62   : > { %683 = vmatpush3.bf16.msra.mxu1 %v777_v13  ;;  %421 = vmatprep.subr.bf16.mxu0 %v778_v14  ;;  %s1146_s11 = scalar_lea.hbm %s1193_s3, %s699_s5  ;;  %p861_p4 = scmp.ne.s32.totalorder %s1141_s26, %s860_s28 }
  0x63   : > { %684 = vmatprep.subr.bf16.mxu1 %v938_v0  ;;  %v275_v59 = vrot.slane %v270_v57, %v274_v55  ;;  %v283_v60 = vrot.slane %v270_v57, %v282_v56  ;;  %v279_v61 = vrot.slane %v270_v57, %v278_v58  ;;  %s941_s29 = smov [#allocation7]  }
  0x64   : > { %p862_p6 = pnand %p861_p4, %p1055_p12  ;;  %s864_s23 = sshll.u32 %s941_s29, 4  ;;  %s865_s23 = int_to_ptr.vmem [resolvable:$false] %s864_s23 }
  0x65   : > { %422 = vmatpush1.bf16.msra.mxu0 %v780_v15  ;;  %s866_s30 = scalar_lea.vmem %s865_s23, 768  ;;  %p867_p10 = scmp.lt.s32.totalorder %s1141_s26, %s865_s23 }
  0x66   : > { %685 = vmatpush3.bf16.msra.mxu1 %v781_v16  ;;  %423 = vmatprep.subr.bf16.mxu0 %v782_v17  ;;  %p863_p8 = pneg %p862_p6  ;;  %p868_p13 = scmp.lt.s32.totalorder %s866_s30, %s860_s28 }
  0x67   : > { %686 = vmatprep.subr.bf16.mxu1 %v938_v0 }
  0x68   : > { %p869_p3 = por %p868_p13, %p867_p10 }
  0x69   : > { %424 = vmatpush1.bf16.msra.mxu0 %v784_v18 }
  0x6a   : > { %687 = vmatpush3.bf16.msra.mxu1 %v785_v19  ;;  %425 = vmatprep.subr.bf16.mxu0 %v786_v20  ;;  %p870_p7 = pnand %p869_p3, %p863_p8 }
  0x6b   : > { %688 = vmatprep.subr.bf16.mxu1 %v938_v0 }
  0x6d   : > { %426 = vmatpush1.bf16.msra.mxu0 %v788_v21 }
  0x6e   : > { %689 = vmatpush3.bf16.msra.mxu1 %v789_v22  ;;  %427 = vmatprep.subr.bf16.mxu0 %v790_v23 }
  0x6f   : > { %690 = vmatprep.subr.bf16.mxu1 %v938_v0 }
  0x71   : > { %428 = vmatpush1.bf16.msra.mxu0 %v792_v24 }
  0x72   : > { %691 = vmatpush3.bf16.msra.mxu1 %v793_v25  ;;  %429 = vmatprep.subr.bf16.mxu0 %v794_v26 }
  0x73   : > { %692 = vmatprep.subr.bf16.mxu1 %v938_v0 }
  0x75   : > { %430 = vmatpush1.bf16.msra.mxu0 %v796_v28 }
  0x76   : > { %693 = vmatpush3.bf16.msra.mxu1 %v797_v29 }
  0xe4   : > { %v210_v30 = vpop.xlane.xlu0 %209 }
  0xe5   : > { %v219_v31 = vmul.f32 0.0078125, %v210_v30 }
  0xe6   : > { %v216_v32 = vpop.xlane.xlu1 %215 }
  0xe7   : > { %v223_v33 = vmul.f32 %v219_v31, %v219_v31  ;;  %v221_v34 = vmul.f32 0.0078125, %v216_v32  ;;  %v233_v47 = vsub.f32 %v1116_v1, %v219_v31 }
  0xe8   : > { %v212_v35 = vpop.xlane.xlu0 %211 }
  0xe9   : > { %v225_v36 = vsub.f32 %v221_v34, %v223_v33  ;;  %v220_v37 = vmul.f32 0.0078125, %v212_v35 }
  0xea   : > { %v218_v38 = vpop.xlane.xlu1 %217 }
  0xeb   : > { %v227_v39 = vmax.f32 %v225_v36, 0.0  ;;  %v224_v40 = vmul.f32 %v220_v37, %v220_v37  ;;  %v222_v41 = vmul.f32 0.0078125, %v218_v38  ;;  %v234_v48 = vsub.f32 %v1118_v2, %v220_v37 }
  0xed   : > { %v229_v42 = vadd.f32 1e-05, %v227_v39  ;;  %v226_v43 = vsub.f32 %v222_v41, %v224_v40 }
  0xef   : > { %v228_v44 = vmax.f32 %v226_v43, 0.0  ;;  %798 = vrsqrt.f32 %v229_v42 }
  0xf1   : > { %v230_v45 = vadd.f32 1e-05, %v228_v44 }
  0xf3   : > { %800 = vrsqrt.f32 %v230_v45 }
  0xf9   : > { %v799_v46 = vpop.eup %798 }
  0xfa   : > { %v235_v50 = vmul.f32 %v799_v46, %v233_v47 }
  0xfd   : > { %v801_v49 = vpop.eup %800 }
  0xfe   : > { %v236_v51 = vmul.f32 %v801_v49, %v234_v48 }
 0x100   : > { %v237_v52 = vpack.c.bf16 %v236_v51, %v235_v50 }
 0x102   : > { %448 = vmatmul.mubr.bf16.vlgmr.msra.gmra.mrb[0].mxu0 %v237_v52  ;;  %695 = vmatmul.mubr.bf16.vlgmr.msra.gmra.mrb[0].mxu1 %v237_v52 }
 0x1d5   : > { %v449_v62 = vpop.f32.mrb[0].mxu0  ;;  %v492_v63 = vpop.f32.mrb[0].mxu1 }
 0x1d6   : > { %v450_v0 = vadd.f32 %v449_v62, %v275_v59  ;;  %v493_v1 = vadd.f32 %v492_v63, %v283_v60  ;;  %v451_v2 = vpop.f32.mrb[1].mxu0  ;;  %v696_v3 = vpop.f32.mrb[1].mxu1 }
 0x1d7   : > { %v452_v4 = vadd.f32 %v451_v2, %v279_v61  ;;  %v453_v5 = vpop.f32.mrb[2].mxu0  ;;  %v495_v6 = vpop.f32.mrb[2].mxu1 }
 0x1d8   : > { %v666_v7 = vpack.c.bf16 %v493_v1, %v493_v1  ;;  %v454_v8 = vadd.f32 %v453_v5, %v275_v59  ;;  %v496_v9 = vadd.f32 %v495_v6, %v283_v60  ;;  %v455_v10 = vpop.f32.mrb[3].mxu0  ;;  %v697_v11 = vpop.f32.mrb[3].mxu1 }
 0x1d9   : > { %v665_v12 = vpack.c.bf16 %v452_v4, %v450_v0  ;;  %v456_v13 = vadd.f32 %v455_v10, %v279_v61 }
 0x1da   : > { %520 = vst [vmem:[%s203_s25 + $0x8] sm:$0xf] %v666_v7  ;;  %v668_v14 = vpack.c.bf16 %v496_v9, %v496_v9 }
 0x1db   : > { %519 = vst [vmem:[%s203_s25] sm:$0xff] %v665_v12  ;;  %v667_v15 = vpack.c.bf16 %v456_v13, %v454_v8 }
 0x1dc   : > { %522 = vst [vmem:[%s203_s25 + $0x14] sm:$0xf] %v668_v14 }
 0x1dd   : > { %521 = vst [vmem:[%s203_s25 + $0xc] sm:$0xff] %v667_v15 }
 0x1de   : > { %873 = shalt.err (!%p870_p7)
}
 0x1df   : > { %s874_s22 = scalar_lea.hbm %s1146_s11, 384  ;;  %s878_s9 = scalar_lea.hbm %s1193_s3, 768 }
 0x1e0   : > { %p875_p9 = scmp.ne.s32.totalorder %s1146_s11, %s874_s22  ;;  %p879_p5 = scmp.lt.u32.totalorder %s1146_s11, %s1193_s3 }
 0x1e1   : > { %p880_p1 = scmp.lt.u32.totalorder %s878_s9, %s874_s22  ;;  %p882_p4 = scmp.lt.u32.totalorder %s874_s22, %s1146_s11 }
 0x1e2   : > { %p876_p2 = pnand %p875_p9, %p1055_p12 }
 0x1e3   : > { %p881_p11 = por %p880_p1, %p879_p5 }
 0x1e4   : > { %p877_p0 = pneg %p876_p2 }
 0x1e5   : > { %p883_p6 = por %p882_p4, %p881_p11 }
 0x1e7   : > { %p884_p8 = pnand %p883_p6, %p877_p0 }
 0x1e9   : > { %887 = shalt.err (!%p884_p8)
}
 0x1ea   : > { %s942_s4 = smov 192   ;;  %s943_s25 = smov 12  }
 0x1eb   : > { %706 = dma.vmem_to_hbm [thread:$0]  (%p1055_p12), %s1141_s26, 384, %s1146_s11, %s524_s27, %s942_s4, %s942_s4, %s943_s25  }
 0x1ec PF: > { %s553_s5 = sand.u32 1, %s918_s12   ;;  %p1208_p10 = scmp.ne.s32.totalorder %s1198_s19, 0 }
 0x1ed   : > { %p1209_p13 = scmp.ge.s32.totalorder %s930_s15, 2  ;;  %s554_s16 = scalar_lea.sflag [#allocation4], %s553_s5 }
 0x1ef   : > { %p717_p3 = pnand %p1209_p13, %p1208_p10 }
 0x1f1   : > { %913 = dma.done.wait (!%p717_p3), %s554_s16, 384  }
 0x1f2   : > { %915 = vsyncadd (!%p717_p3), %s554_s16, 4294966912  ;;  %p17_p7 = scmp.ge.s32.totalorder %s1020_s24, 4   ;;  %s1210_s12 = smov %s922_s13 }
 0x1f3   : > { %s1211_s13 = smov %s926_s14  ;;  %s1212_s14 = smov %s1051_s17 }
 0x1f4   : > { %s1213_s15 = smov %s1020_s24  ;;  %19 = sbr.rel (!%p17_p7) target bundleno = 6 (0x6), region = 81 }
 0x1fb   :  { %559 = vsyncpa [#allocation3], 1 }
 0x1fc   :  { %561 = vsyncpa [#allocation3 + $0x1], 1 }
 0x1fd   :  { %562 = vsyncpa [#allocation6], 1 }
 0x1fe   :  { %563 = vsyncpa [#allocation4], 1 }
 0x1ff   :  { %565 = vsyncpa [#allocation4 + $0x1], 1 }

</bundles_post_ra>
